<compile_context>
chip_gen: v7x
topology: tpu7x:2x2x1
jax: 0.10.0
libtpu: 0.0.40
codegen_flags: <defaults>
</compile_context>

<pallas_src>
import functools
import math

import jax
import jax.numpy as jnp
from jax.experimental import pallas as pl
from jax.experimental.pallas import tpu as pltpu


def _round_up(x, m):
    return (x + m - 1) // m * m


def _cdiv(a, b):
    return -(-a // b)


def _vmem_capacity_bytes():
    """Physical VMEM per core; conservative (v7x-sized) fallback."""
    try:
        info = pltpu.get_tpu_info()
        for attr in ("vmem_capacity_bytes", "vmem_size_bytes", "vmem_bytes"):
            v = getattr(info, attr, None)
            if v:
                return int(v)
    except Exception:
        pass
    return 64 << 20


def _spatial_sum_f32(x):
    """Sum over the last (lane) axis of a (tile_n, C, S) f32 array.

    Two-stage: accumulate 128-wide lane chunks with VPU adds (tile-aligned
    static slices, no relayout), then a single cross-lane XLU reduce.
    # TODO(synk): if a bundle dump still shows XLU as the critical slot,
    # route this through the idle MXU (x @ ones((S, 128)) column) instead.
    """
    s = x.shape[-1]
    n_full = s // 128
    if n_full >= 2:
        partial = x[:, :, 0:128]
        for blk in range(1, n_full):
            partial = partial + x[:, :, blk * 128:(blk + 1) * 128]
        total = jnp.sum(partial, axis=-1)
        rem = s - n_full * 128
        if rem:
            total = total + jnp.sum(x[:, :, n_full * 128:], axis=-1)
        return total
    return jnp.sum(x, axis=-1)


def _kernel_single(x_ref, w_ref, b_ref, o_ref, *, inv_s):
    """Single-pass path: one grid step per batch tile (tile_s == S)."""
    # x_ref : (tile_n, C, S) native dtype; upcast at load (v5e has no bf16 VPU)
    # w_ref : (C, K_pad) f32 (VMEM-resident), b_ref : (1, K_pad) f32
    x = x_ref[...].astype(jnp.float32)
    pooled = _spatial_sum_f32(x) * inv_s                      # (tile_n, C)
    out = jnp.dot(pooled, w_ref[...], preferred_element_type=jnp.float32)
    o_ref[...] = (out + b_ref[...]).astype(o_ref.dtype)


def _kernel_tiled(x_ref, w_ref, b_ref, o_ref, acc_ref, *, inv_s, s_total, ragged):
    """Spatial-streaming path with a (tile_n, C, 128) VPU accumulator."""
    j = pl.program_id(1)

    @pl.when(j == 0)
    def _init():
        acc_ref[...] = jnp.zeros_like(acc_ref)

    x = x_ref[...].astype(jnp.float32)
    tile_s = x.shape[-1]

    if ragged:
        # Mask out-of-bounds lanes of the last chunk: x is NOT padded in HBM,
        # so the partial edge block reads unspecified values there.
        lane = jax.lax.broadcasted_iota(jnp.int32, x.shape, 2)
        x = jnp.where(j * tile_s + lane < s_total, x, 0.0)

    # VPU-only accumulation across the 128-wide lane sub-chunks; the single
    # cross-lane XLU reduce is deferred to the finalize step below.
    partial = x[:, :, 0:128]
    for blk in range(1, tile_s // 128):
        partial = partial + x[:, :, blk * 128:(blk + 1) * 128]
    acc_ref[...] += partial

    @pl.when(j == pl.num_programs(1) - 1)
    def _finalize():
        pooled = jnp.sum(acc_ref[...], axis=-1) * inv_s       # one XLU reduce
        out = jnp.dot(pooled, w_ref[...], preferred_element_type=jnp.float32)
        o_ref[...] = (out + b_ref[...]).astype(o_ref.dtype)


def classifier_forward(x_last, weight, bias, *, tile_n=None, tile_s=None):
    """ClassifierModule.forward for a global-average-pool head.

    x_last : (N, C, H, W) feature map (f32 or bf16; streamed in native dtype)
    weight : (num_classes, C) linear weight (PyTorch layout)
    bias   : (num_classes,)  linear bias
    returns (N, num_classes) f32 logits
    """
    n, c, h, w = x_last.shape
    num_classes = weight.shape[0]
    s = h * w
    itemsize = x_last.dtype.itemsize

    k_pad = _round_up(num_classes, 128)       # lane-dense matmul N-dim / store

    # ---- generation-aware scoped-VMEM budget -------------------------------
    phys_vmem = _vmem_capacity_bytes()
    vmem_limit = min(96 << 20, (phys_vmem * 3) // 4)   # 96MiB v5e/v6e, 48MiB v7x

    # ---- batch tile: 32-128 rows, >=2 tiles when possible (v7x megacore) ---
    if tile_n is None:
        if n <= 8:
            tile_n = n                                  # exact, no padded rows
        else:
            tile_n = min(128, _round_up(n, 8))
            while tile_n > 8 and _cdiv(n, tile_n) < 2:
                tile_n = max(8, _round_up(tile_n // 2, 8))
    elif tile_n >= n:
        tile_n = n
    else:
        tile_n = max(8, _round_up(tile_n, 8))

    def _x_budget(tn):
        # weight + bias + double-buffered output + tiled-path scratch + margin
        resident = 4 * (c * k_pad + k_pad + 2 * tn * k_pad + tn * c * 128)
        return max(vmem_limit - resident - (4 << 20), vmem_limit // 4)

    # ---- spatial tile -------------------------------------------------------
    if tile_s is None:
        if 2 * tile_n * c * s * itemsize <= _x_budget(tile_n):
            tile_s = s                                  # single-pass path
        else:
            while (tile_n > 8
                   and 2 * tile_n * c * 128 * itemsize > _x_budget(tile_n)):
                tile_n = max(8, _round_up(tile_n // 2, 8))
            chunk = 2 * tile_n * c * 128 * itemsize
            if chunk > _x_budget(tile_n):
                # wide-channel f32 corner case: widen the scoped limit instead
                vmem_limit = min(phys_vmem, chunk + (16 << 20))
            tile_s = max(128, min(_round_up(s, 128),
                                  (_x_budget(tile_n) // chunk) * 128))
    elif tile_s >= s:
        tile_s = s
    else:
        tile_s = max(128, _round_up(tile_s, 128))

    n_pad = _round_up(n, tile_n)
    n_tiles = n_pad // tile_n

    # ---- small resident tensors (cheap; the big x is never copied) ---------
    x3 = x_last.reshape(n, c, s)
    w_pad = jnp.zeros((c, k_pad), jnp.float32).at[:, :num_classes].set(
        weight.T.astype(jnp.float32))
    b_pad = jnp.zeros((1, k_pad), jnp.float32).at[0, :num_classes].set(
        bias.astype(jnp.float32))
    inv_s = 1.0 / float(s)

    cost = pl.CostEstimate(
        flops=n * c * s + 2 * n * c * k_pad,
        transcendentals=0,
        bytes_accessed=(x3.size * itemsize + w_pad.size * 4 + b_pad.size * 4
                        + n_pad * k_pad * 4),
    )

    if tile_s == s:
        # ---- single-pass: grid over batch tiles only -----------------------
        out = pl.pallas_call(
            functools.partial(_kernel_single, inv_s=inv_s),
            out_shape=jax.ShapeDtypeStruct((n_pad, k_pad), jnp.float32),
            grid=(n_tiles,),
            in_specs=[
                pl.BlockSpec((tile_n, c, s), lambda i: (i, 0, 0)),
                pl.BlockSpec((c, k_pad), lambda i: (0, 0)),   # weight: resident
                pl.BlockSpec((1, k_pad), lambda i: (0, 0)),   # bias:   resident
            ],
            out_specs=pl.BlockSpec((tile_n, k_pad), lambda i: (i, 0)),
            compiler_params=pltpu.CompilerParams(
                dimension_semantics=("parallel",),
                vmem_limit_bytes=int(vmem_limit),
            ),
            cost_estimate=cost,
        )(x3, w_pad, b_pad)
    else:
        # ---- spatial-streaming fallback ------------------------------------
        s_tiles = _cdiv(s, tile_s)
        ragged = (s_tiles * tile_s) != s
        out = pl.pallas_call(
            functools.partial(_kernel_tiled, inv_s=inv_s, s_total=s,
                              ragged=ragged),
            out_shape=jax.ShapeDtypeStruct((n_pad, k_pad), jnp.float32),
            grid=(n_tiles, s_tiles),
            in_specs=[
                pl.BlockSpec((tile_n, c, tile_s), lambda i, j: (i, 0, j)),
                pl.BlockSpec((c, k_pad), lambda i, j: (0, 0)),
                pl.BlockSpec((1, k_pad), lambda i, j: (0, 0)),
            ],
            out_specs=pl.BlockSpec((tile_n, k_pad), lambda i, j: (i, 0)),
            scratch_shapes=[pltpu.VMEM((tile_n, c, 128), jnp.float32)],
            compiler_params=pltpu.CompilerParams(
                dimension_semantics=("parallel", "arbitrary"),
                vmem_limit_bytes=int(vmem_limit),
            ),
            cost_estimate=cost,
        )(x3, w_pad, b_pad)

    return out[:n, :num_classes]


def reference_forward(x_last, weight, bias):
    n, c = x_last.shape[:2]
    pooled = jnp.mean(x_last.reshape(n, c, -1).astype(jnp.float32), axis=-1)
    return pooled @ weight.T.astype(jnp.float32) + bias.astype(jnp.float32)


if __name__ == "__main__":
    key = jax.random.PRNGKey(0)
    k_x, k_w, k_b = jax.random.split(key, 3)

    # Small shapes consistent with the module: batch=2, channel=4, spatial=16.
    N, C, H, W = 2, 4, 16, 16
    num_classes = 10

    # x is a "list" of feature maps in MSDNet; the module uses x[-1].
    x_list = [jax.random.normal(k_x, (N, C, H, W), dtype=jnp.float32)]

    # Deterministic Linear(channel, num_classes) init (PyTorch default U(-k,k)).
    bound = 1.0 / math.sqrt(C)
    weight = jax.random.uniform(k_w, (num_classes, C), jnp.float32, -bound, bound)
    bias = jax.random.uniform(k_b, (num_classes,), jnp.float32, -bound, bound)

    # 1) Auto path: tile_s == S -> single-pass kernel (no spatial grid, no
    #    scratch, no pl.when); no padding of x anywhere.
    out = jax.block_until_ready(classifier_forward(x_list[-1], weight, bias))
    ref = reference_forward(x_list[-1], weight, bias)
    assert out.shape == (N, num_classes)
    assert jnp.allclose(out, ref, atol=1e-5, rtol=1e-5), "single-pass mismatch"

    # 2) Spatial-streaming path with a ragged tail (S=225, tile_s=128):
    #    exercises the in-kernel lane masking + (tile_n, C, 128) accumulator.
    x_ragged = jax.random.normal(k_x, (N, C, 15, 15), dtype=jnp.float32)
    out2 = jax.block_until_ready(
        classifier_forward(x_ragged, weight, bias, tile_s=128))
    ref2 = reference_forward(x_ragged, weight, bias)
    assert jnp.allclose(out2, ref2, atol=1e-5, rtol=1e-5), "tiled mismatch"

    # 3) Native bf16 streaming (halves HBM traffic; accumulation stays f32).
    x_bf16 = x_list[-1].astype(jnp.bfloat16)
    out3 = jax.block_until_ready(classifier_forward(x_bf16, weight, bias))
    ref3 = reference_forward(x_bf16, weight, bias)
    assert jnp.allclose(out3, ref3, atol=1e-4, rtol=1e-4), "bf16 mismatch"

    print("KERNEL_OK")
</pallas_src>

<mosaic_0001>
module attributes {stable_mosaic.version = 11 : i64} {
  func.func @_kernel_single(%arg0: i32, %arg1: memref<2x4x256xf32, #tpu.memory_space<vmem>>, %arg2: memref<4x128xf32, #tpu.memory_space<vmem>>, %arg3: memref<1x128xf32, #tpu.memory_space<vmem>>, %arg4: memref<2x128xf32, #tpu.memory_space<vmem>>) attributes {dimension_semantics = [#tpu.dimension_semantics<parallel>], iteration_bounds = array<i64: 1>, scalar_prefetch = 0 : i64, scratch_operands = 0 : i64, tpu.core_type = #tpu.core_type<tc>, window_params = [{transform_indices = @transform_0, window_bounds = array<i64: 2, 4, 256>}, {pipeline_mode = #tpu.pipeline_mode<synchronous>, transform_indices = @transform_1, window_bounds = array<i64: 4, 128>}, {pipeline_mode = #tpu.pipeline_mode<synchronous>, transform_indices = @transform_2, window_bounds = array<i64: 1, 128>}, {transform_indices = @transform_3, window_bounds = array<i64: 2, 128>}]} {
    %c0 = arith.constant 0 : index
    %c0_0 = arith.constant 0 : index
    %c0_1 = arith.constant 0 : index
    %0 = vector.load %arg1[%c0, %c0_0, %c0_1] : memref<2x4x256xf32, #tpu.memory_space<vmem>>, vector<2x4x256xf32>
    %1 = vector.extract_strided_slice %0 {offsets = [0, 0, 0], sizes = [2, 4, 128], strides = [1, 1, 1]} : vector<2x4x256xf32> to vector<2x4x128xf32>
    %2 = vector.extract_strided_slice %0 {offsets = [0, 0, 128], sizes = [2, 4, 128], strides = [1, 1, 1]} : vector<2x4x256xf32> to vector<2x4x128xf32>
    %3 = arith.addf %1, %2 : vector<2x4x128xf32>
    %cst = arith.constant dense<0.000000e+00> : vector<2x4xf32>
    %4 = vector.multi_reduction <add>, %3, %cst [2] : vector<2x4x128xf32> to vector<2x4xf32>
    %cst_2 = arith.constant 3.906250e-03 : f32
    %5 = vector.broadcast %cst_2 : f32 to vector<2x4xf32>
    %6 = arith.mulf %4, %5 : vector<2x4xf32>
    %c0_3 = arith.constant 0 : index
    %c0_4 = arith.constant 0 : index
    %7 = vector.load %arg2[%c0_3, %c0_4] : memref<4x128xf32, #tpu.memory_space<vmem>>, vector<4x128xf32>
    %cst_5 = arith.constant dense<0.000000e+00> : vector<2x128xf32>
    %8 = tpu.matmul %6, %7, %cst_5 {dimension_numbers = #tpu.dot_dimension_numbers<[1], [0], [0], [1], [0, 0, 1, 1], [], []>} : vector<2x4xf32>, vector<4x128xf32>, vector<2x128xf32> -> vector<2x128xf32>
    %c0_6 = arith.constant 0 : index
    %c0_7 = arith.constant 0 : index
    %9 = vector.load %arg3[%c0_6, %c0_7] : memref<1x128xf32, #tpu.memory_space<vmem>>, vector<1x128xf32>
    %10 = vector.broadcast %9 : vector<1x128xf32> to vector<2x128xf32>
    %11 = arith.addf %8, %10 : vector<2x128xf32>
    %c0_8 = arith.constant 0 : index
    %c0_9 = arith.constant 0 : index
    %12 = vector.load %arg4[%c0_8, %c0_9] : memref<2x128xf32, #tpu.memory_space<vmem>>, vector<2x128xf32>
    tpu.vector_store %arg4[%c0_8, %c0_9], %11 {strides = array<i32>} : memref<2x128xf32, #tpu.memory_space<vmem>>, vector<2x128xf32>,
    return
  }
  func.func @transform_0(%arg0: i32) -> (i32, i32, i32) {
    %c0_i32 = arith.constant 0 : i32
    %c0_i32_0 = arith.constant 0 : i32
    %c0_i32_1 = arith.constant 0 : i32
    return %arg0, %c0_i32, %c0_i32_0 : i32, i32, i32
  }
  func.func @transform_1(%arg0: i32) -> (i32, i32) {
    %c0_i32 = arith.constant 0 : i32
    %c0_i32_0 = arith.constant 0 : i32
    %c0_i32_1 = arith.constant 0 : i32
    return %c0_i32, %c0_i32_0 : i32, i32
  }
  func.func @transform_2(%arg0: i32) -> (i32, i32) {
    %c0_i32 = arith.constant 0 : i32
    %c0_i32_0 = arith.constant 0 : i32
    %c0_i32_1 = arith.constant 0 : i32
    return %c0_i32, %c0_i32_0 : i32, i32
  }
  func.func @transform_3(%arg0: i32) -> (i32, i32) {
    %c0_i32 = arith.constant 0 : i32
    %c0_i32_0 = arith.constant 0 : i32
    return %arg0, %c0_i32 : i32, i32
  }
}

</mosaic_0001>

<bundles_post_ra>
// kernel: tpu_custom_call.1
= control target key start
LH: loop header
LB: loop body
LE: loop exit
PB: predicated region body
PF: predicated region fallthrough
CT: control target
= control target key end

     0   :  { %8 = vsyncpa [#allocation3], 0  ;;  %s330_s0 = inlined_call_operand.hbm [shape: f32[2,4,256], index: 0, kind: input, shape index: {}]   ;;  %s331_s1 = inlined_call_operand.hbm [shape: f32[4,128], index: 1, kind: input, shape index: {}]   ;;  %s332_s2 = inlined_call_operand.vmem [shape: f32[1,128], index: 2, kind: input, shape index: {}]   ;;  %s333_s3 = inlined_call_operand.hbm [shape: f32[2,128], index: 3, kind: output, shape index: {}]  }
   0x1   :  { %9 = vsyncpa [#allocation6], 0 }
   0x2   :  { %10 = vsyncpa [#allocation4], 0  ;;  %s264_s12 = smov [#allocation2]   ;;  %s192_s16 = scalar_lea.hbm %s330_s0, 256 }
   0x3   :  { %s16_s13 = sshll.u32 %s264_s12, 4  ;;  %p193_p0 = scmp.ne.s32.totalorder %s330_s0, %s192_s16  ;;  %s17_s13 = int_to_ptr.vmem [resolvable:$true] %s16_s13 }
   0x4   :  { %p196_p1 = scmp.lt.u32.totalorder %s192_s16, %s330_s0 }
   0x6   :  { %p198_p2 = pnand %p196_p1, %p193_p0 }
   0x8   :  { %201 = shalt.err (!%p198_p2)
}
   0x9   :  { %s202_s21 = scalar_lea.vmem %s17_s13, 256  ;;  %p207_p4 = scmp.lt.s32.totalorder %s17_s13, %s17_s13 }
   0xa   :  { %p203_p3 = scmp.ne.s32.totalorder %s17_s13, %s202_s21  ;;  %p208_p5 = scmp.lt.s32.totalorder %s202_s21, %s202_s21 }
   0xc   :  { %p209_p6 = por %p208_p5, %p207_p4 }
   0xe   :  { %p210_p7 = pnand %p209_p6, %p203_p3 }
  0x10   :  { %213 = shalt.err (!%p210_p7)
}
  0x11   :  { %s265_s22 = smov 128   ;;  %s266_s23 = smov 8  }
  0x12   :  { %22 = dma.hbm_to_vmem [thread:$0]  %s330_s0, 256, %s17_s13, [#allocation3], %s265_s22, %s265_s22, %s266_s23  }
  0x13   :  { %s267_s26 = smov [#allocation5]   ;;  %s214_s30 = scalar_lea.hbm %s331_s1, 64 }
  0x14   :  { %s29_s27 = sshll.u32 %s267_s26, 4  ;;  %p215_p8 = scmp.ne.s32.totalorder %s331_s1, %s214_s30  ;;  %s30_s27 = int_to_ptr.vmem [resolvable:$true] %s29_s27 }
  0x15   :  { %p218_p9 = scmp.lt.u32.totalorder %s214_s30, %s331_s1 }
  0x17   :  { %p220_p10 = pnand %p218_p9, %p215_p8 }
  0x19   :  { %223 = shalt.err (!%p220_p10)
}
  0x1a   :  { %s224_s8 = scalar_lea.vmem %s30_s27, 64  ;;  %p229_p12 = scmp.lt.s32.totalorder %s30_s27, %s30_s27 }
  0x1b   :  { %p225_p11 = scmp.ne.s32.totalorder %s30_s27, %s224_s8  ;;  %p230_p13 = scmp.lt.s32.totalorder %s224_s8, %s224_s8 }
  0x1d   :  { %p231_p0 = por %p230_p13, %p229_p12 }
  0x1f   :  { %p232_p1 = pnand %p231_p0, %p225_p11 }
  0x21   :  { %235 = shalt.err (!%p232_p1)
}
  0x22   :  { %32 = dma.hbm_to_vmem [thread:$0]  %s331_s1, 64, %s30_s27, [#allocation6]  }
  0x23   :  { %258 = dma.done.wait [#allocation3], 256  }
  0x24   :  { %259 = vsyncadd [#allocation3], 4294967040 }
  0x25   :  { %260 = dma.done.wait [#allocation6], 64  }
  0x26   :  { %261 = vsyncadd [#allocation6], 4294967232  ;;  %v41_v0 = vld [vmem:[#allocation2] sm:$0xff]  ;;  %v42_v1 = vld [vmem:[#allocation2 + $0x8] sm:$0xff]  ;;  %vm51_vm0 = vcmask 1043456   ;;  %v268_v9 = vmov 0.0   ;;  %v70_v10 = vlaneseq }
  0x27   :  { %v45_v2 = vrot.slane %v41_v0, 4  ;;  %v46_v3 = vrot.slane %v42_v1, 4  ;;  %v60_v8 = vld [vmem:[#allocation5] sm:$0xf]  ;;  %180 = vmatprep.subr.mxu0 %v268_v9  ;;  %vm269_vm1 = vmmov 0   ;;  %vm80_vm2 = vcmask 1041409  }
  0x28   :  { %182 = vmatprep.mubr.msk.f32.mxu0 %vm269_vm1, %v268_v9  ;;  %181 = vmatpush3.msk.msra.mxu0 %vm51_vm0, %v60_v8  ;;  %v71_v11 = vand.u32 127, %v70_v10  ;;  %v73_v12 = vshrl.u32 %v70_v10, 7  ;;  %vm82_vm3 = vcmask 31744   ;;  %v175_v21 = vld [vmem:[%s332_s2] ss:$0 sm:$0xff]  ;;  %s270_s11 = smov [#allocation7]  }
  0x29   :  { %v49_v4 = vadd.f32 %v45_v2, %v41_v0  ;;  %v50_v5 = vadd.f32 %v46_v3, %v42_v1  ;;  %s165_s12 = sshll.u32 %s270_s11, 4  ;;  %s166_s12 = int_to_ptr.vmem [resolvable:$true] %s165_s12 }
  0x2a   :  { %v74_v14 = vsub.s32 %v71_v11, %v73_v12  ;;  %s236_s13 = scalar_lea.vmem %s166_s12, 32  ;;  %p241_p3 = scmp.lt.s32.totalorder %s166_s12, %s166_s12 }
  0x2b   :  { %v52_v6 = vsel %vm51_vm0, %v49_v4, 0.0  ;;  %v55_v7 = vsel %vm51_vm0, %v50_v5, 0.0  ;;  %p237_p2 = scmp.ne.s32.totalorder %s166_s12, %s236_s13  ;;  %p242_p4 = scmp.lt.s32.totalorder %s236_s13, %s236_s13 }
  0x2c   :  { %53 = vadd.xlane.f32.xlu0 %v52_v6 }
  0x2d   :  { %p243_p5 = por %p242_p4, %p241_p3 }
  0x2f   :  { %p244_p6 = pnand %p243_p5, %p237_p2 }
  0x30   :  { %56 = vadd.xlane.f32.xlu0 %v55_v7 }
  0xb9   :  { %v54_v13 = vpop.xlane.xlu0 %53 }
  0xba   :  { %v58_v15 = vmul.f32 0.00390625, %v54_v13 }
  0xbc   :  { %v75_v18 = vrot.slane %v58_v15, %v74_v14 }
  0xbd   :  { %v57_v16 = vpop.xlane.xlu0 %56 }
  0xbe   :  { %v59_v17 = vmul.f32 0.00390625, %v57_v16 }
  0xc0   :  { %v79_v19 = vrot.slane %v59_v17, %v74_v14 }
  0xc2   :  { %v81_v20 = vsel %vm80_vm2, %v79_v19, %v75_v18 }
  0xc3   :  { %183 = vmatmul.mubr.msk.f32.vlgmr.msra.gmra.mrb[0].mxu0 %vm82_vm3, %v81_v20 }
 0x196   :  { %v154_v22 = vpop.f32.mrb[0].mxu0 }
 0x197   :  { %v155_v23 = vadd.f32 %v175_v21, %v154_v22  ;;  %v184_v24 = vpop.f32.mrb[1].mxu0 }
 0x199   :  { %158 = vst [vmem:[#allocation7] sm:$0x3] %v155_v23 }
 0x19a   :  { %247 = shalt.err (!%p244_p6)
}
 0x19b   :  { %s248_s16 = scalar_lea.hbm %s333_s3, 32 }
 0x19c   :  { %p249_p7 = scmp.ne.s32.totalorder %s333_s3, %s248_s16  ;;  %p252_p8 = scmp.lt.u32.totalorder %s248_s16, %s333_s3 }
 0x19e   :  { %p254_p9 = pnand %p252_p8, %p249_p7 }
 0x1a0   :  { %257 = shalt.err (!%p254_p9)
}
 0x1a1   :  { %168 = dma.vmem_to_hbm [thread:$0]  %s166_s12, 32, %s333_s3, [#allocation4]  }
 0x1a2   :  { %262 = dma.done.wait [#allocation4], 32  }
 0x1a3   :  { %263 = vsyncadd [#allocation4], 4294967264 }
 0x1a4   :  { %172 = vsyncpa [#allocation3], 1 }
 0x1a5   :  { %173 = vsyncpa [#allocation6], 1 }
 0x1a6   :  { %174 = vsyncpa [#allocation4], 1 }

</bundles_post_ra>
